<compile_context>
chip_gen: v5e
topology: v5e:2x2
jax: 0.10.0
libtpu: 0.0.40
codegen_flags: <defaults>
</compile_context>

<pallas_src>
import functools

import jax
import jax.numpy as jnp
from jax.experimental import pallas as pl
from jax.experimental.pallas import tpu as pltpu


def _cdiv(a: int, b: int) -> int:
    return -(-a // b)


def _round_up(x: int, m: int) -> int:
    return _cdiv(x, m) * m


def _sublane_multiple(dtype) -> int:
    # Native TPU tiling: (8,128) f32, (16,128) bf16, (32,128) int8/fp8.
    return max(8, 32 // jnp.dtype(dtype).itemsize)


def _choose_tile(dim: int, requested: int, align: int) -> int:
    """Align-aware tile close to `requested`, preferring the full (aligned) extent or an
    exact split over padding a big tile multiple."""
    dim_a = _round_up(dim, align)
    requested = max(align, _round_up(requested, align))
    nblocks = max(1, int(round(dim_a / requested)))
    return min(dim_a, _round_up(_cdiv(dim_a, nblocks), align))


def _vmem_budget_bytes() -> int:
    try:
        cap = getattr(pltpu.get_tpu_info(), "vmem_capacity_bytes", None)
        if cap:
            return int(cap) * 3 // 4          # ~48 MiB on v7x, ~96 MiB on v5e/v6e
    except Exception:
        pass
    return 48 * 1024 * 1024                   # conservative fallback (fits v7x's 64 MiB)


def _fit_tiles_to_vmem(tm, tn, tk, in_bytes, out_bytes, use_scratch, budget, sub_m):
    def footprint(tm_, tn_, tk_):
        fp = 2 * (tm_ + tn_) * tk_ * in_bytes   # double-buffered x / W^T slabs
        fp += 2 * tm_ * tn_ * out_bytes         # double-buffered output block
        fp += 2 * tn_ * in_bytes                # bias block (tiny)
        if use_scratch:
            fp += tm_ * tn_ * 4                 # f32 accumulator
        return fp

    while footprint(tm, tn, tk) > budget:
        if tk >= 256:
            tk = _round_up(tk // 2, 128)
        elif tn >= 256:
            tn = _round_up(tn // 2, 128)
        elif tm >= 2 * sub_m:
            tm = _round_up(tm // 2, sub_m)
        else:
            break
    return tm, tn, tk


def _linear_kernel_f32_out(x_ref, wt_ref, b_ref, o_ref):
    """x @ W^T + b, f32 output: accumulate directly into the K-resident output block."""
    k = pl.program_id(2)

    @pl.when(k == 0)
    def _init():
        o_ref[...] = jnp.zeros_like(o_ref)

    o_ref[...] += jnp.dot(x_ref[...], wt_ref[...], preferred_element_type=jnp.float32)

    @pl.when(k == pl.num_programs(2) - 1)
    def _finalize():
        o_ref[...] += b_ref[...].astype(jnp.float32)


def _linear_kernel_acc(x_ref, wt_ref, b_ref, o_ref, acc_ref):
    """x @ W^T + b with an f32 scratch accumulator (for non-f32 outputs)."""
    k = pl.program_id(2)

    @pl.when(k == 0)
    def _init():
        acc_ref[...] = jnp.zeros_like(acc_ref)

    acc_ref[...] += jnp.dot(x_ref[...], wt_ref[...], preferred_element_type=jnp.float32)

    @pl.when(k == pl.num_programs(2) - 1)
    def _finalize():
        o_ref[...] = (acc_ref[...] + b_ref[...].astype(jnp.float32)).astype(o_ref.dtype)


@functools.partial(jax.jit, static_argnames=("compute_dtype", "tm", "tn", "tk"))
def implements_interface_forward(x, weight_t, bias, *, compute_dtype=None,
                                 tm=512, tn=512, tk=2048):
    """forward(x) = layer(x) with layer = Linear(hidden_in -> hidden_out).

    x:        (batch, seq, hidden_in)
    weight_t: (hidden_in, hidden_out)  -- PRE-TRANSPOSED nn.Linear weight (K, N)
    bias:     (hidden_out,)
    compute_dtype: optional dtype (e.g. jnp.bfloat16) to cast x/W to for the MXU;
                   accumulation is always f32, output keeps x's original dtype.
    returns (batch, seq, hidden_out)
    """
    out_dtype = x.dtype
    b, s, k_dim = x.shape
    k_dim_w, n = weight_t.shape
    assert k_dim_w == k_dim, "weight_t must be (hidden_in, hidden_out)"
    m = b * s
    x2d = x.reshape(m, k_dim)

    if compute_dtype is not None:
        x2d = x2d.astype(compute_dtype)
        weight_t = weight_t.astype(compute_dtype)
    cdtype = x2d.dtype
    in_bytes = jnp.dtype(cdtype).itemsize
    out_bytes = jnp.dtype(out_dtype).itemsize
    use_scratch = jnp.dtype(out_dtype) != jnp.dtype(jnp.float32)

    # ---- tile selection (alignment-aware, minimal padding) ----
    sub = _sublane_multiple(cdtype)
    n_align = 256 if _round_up(n, 128) % 256 == 0 else 128   # fill v6e/v7x 256-wide passes
    tm = _choose_tile(m, tm, sub)
    tn = _choose_tile(n, tn, n_align)
    tk = _choose_tile(k_dim, tk, 128)

    # Fit the pipelined working set into ~3/4 of physical VMEM (generation-aware).
    budget = _vmem_budget_bytes()
    tm, tn, tk = _fit_tiles_to_vmem(tm, tn, tk, in_bytes, out_bytes,
                                    use_scratch, budget - (4 << 20), sub)

    # v7x has 2 TensorCores: ensure the parallel (i, j) grid has >= 2 blocks when possible.
    if _cdiv(m, tm) * _cdiv(n, tn) < 2:
        if m > sub:
            tm = max(sub, _round_up(_cdiv(m, 2), sub))
        elif n > 128:
            tn = max(128, _round_up(_cdiv(n, 2), 128))

    m_p, n_p, k_p = _round_up(m, tm), _round_up(n, tn), _round_up(k_dim, tk)

    # Zero-pad to tile multiples (K/N zero padding is mathematically neutral;
    # padded M rows / N cols are sliced off below).
    if (m_p, k_p) != (m, k_dim):
        x2d = jnp.pad(x2d, ((0, m_p - m), (0, k_p - k_dim)))
    w_p = weight_t
    if (k_p, n_p) != (k_dim, n):
        w_p = jnp.pad(weight_t, ((0, k_p - k_dim), (0, n_p - n)))
    b_p = bias if n_p == n else jnp.pad(bias, (0, n_p - n))
    b_p = b_p.reshape(1, n_p)

    grid = (m_p // tm, n_p // tn, k_p // tk)

    cost = pl.CostEstimate(
        flops=2 * m_p * n_p * k_p,
        transcendentals=0,
        bytes_accessed=(m_p * k_p + n_p * k_p) * in_bytes
                       + n_p * b_p.dtype.itemsize
                       + m_p * n_p * out_bytes,
    )

    kernel = _linear_kernel_acc if use_scratch else _linear_kernel_f32_out
    scratch = [pltpu.VMEM((tm, tn), jnp.float32)] if use_scratch else []

    out2d = pl.pallas_call(
        kernel,
        out_shape=jax.ShapeDtypeStruct((m_p, n_p), out_dtype),
        grid=grid,
        in_specs=[
            pl.BlockSpec((tm, tk), lambda i, j, k: (i, k)),    # x tile (M, K)
            pl.BlockSpec((tk, tn), lambda i, j, k: (k, j)),    # W^T tile (K, N)
            pl.BlockSpec((1, tn), lambda i, j, k: (0, j)),     # bias tile
        ],
        out_specs=pl.BlockSpec((tm, tn), lambda i, j, k: (i, j)),
        scratch_shapes=scratch,
        compiler_params=pltpu.CompilerParams(
            dimension_semantics=("parallel", "parallel", "arbitrary"),
            vmem_limit_bytes=int(budget),
        ),
        cost_estimate=cost,
    )(x2d, w_p, b_p)

    return out2d[:m, :n].reshape(b, s, n)


if __name__ == "__main__":
    # Small shapes consistent with the forward: batch=2, seq=8, hidden=32.
    batch, seq, hidden = 2, 8, 32

    key = jax.random.PRNGKey(0)
    kx, kw, kb = jax.random.split(key, 3)

    x = jax.random.normal(kx, (batch, seq, hidden), dtype=jnp.float32)
    # Deterministic "nn.Linear(hidden, hidden)" parameters (PyTorch (out, in) layout).
    weight = jax.random.normal(kw, (hidden, hidden), dtype=jnp.float32) / jnp.sqrt(hidden)
    bias = jax.random.normal(kb, (hidden,), dtype=jnp.float32) * 0.01

    # Pre-transpose the static weight ONCE, outside the per-call hot path.
    weight_t = jnp.asarray(weight.T)

    ref = x @ weight.T + bias

    # f32 path (direct accumulation into the K-resident output block, no scratch).
    out = jax.block_until_ready(implements_interface_forward(x, weight_t, bias))
    assert out.shape == (batch, seq, hidden)
    assert jnp.allclose(out, ref, atol=1e-5, rtol=1e-5), "f32 path mismatch vs reference"

    # bf16-compute path (f32 accumulation / f32 output) -- recommended MXU mode for f32 callers.
    out_bf16c = jax.block_until_ready(
        implements_interface_forward(x, weight_t, bias, compute_dtype=jnp.bfloat16))
    assert jnp.allclose(out_bf16c, ref, atol=5e-2, rtol=5e-2), "bf16-compute mismatch"

    # bf16-in / bf16-out path (exercises the f32 scratch-accumulator kernel).
    out_bf16 = jax.block_until_ready(
        implements_interface_forward(x.astype(jnp.bfloat16),
                                     weight_t.astype(jnp.bfloat16),
                                     bias.astype(jnp.bfloat16)))
    assert jnp.allclose(out_bf16.astype(jnp.float32), ref, atol=5e-2, rtol=5e-2), \
        "bf16 path mismatch"

    print("KERNEL_OK")
</pallas_src>

<mosaic_0001>
module attributes {stable_mosaic.version = 11 : i64} {
  func.func @_linear_kernel_f32_out(%arg0: i32, %arg1: i32, %arg2: i32, %arg3: memref<8x128xf32, #tpu.memory_space<vmem>>, %arg4: memref<128x128xf32, #tpu.memory_space<vmem>>, %arg5: memref<1x128xf32, #tpu.memory_space<vmem>>, %arg6: memref<8x128xf32, #tpu.memory_space<vmem>>) attributes {dimension_semantics = [#tpu.dimension_semantics<parallel>, #tpu.dimension_semantics<parallel>, #tpu.dimension_semantics<arbitrary>], iteration_bounds = array<i64: 2, 1, 1>, scalar_prefetch = 0 : i64, scratch_operands = 0 : i64, tpu.core_type = #tpu.core_type<tc>, window_params = [{transform_indices = @transform_0, window_bounds = array<i64: 8, 128>}, {transform_indices = @transform_1, window_bounds = array<i64: 128, 128>}, {transform_indices = @transform_2, window_bounds = array<i64: 1, 128>}, {transform_indices = @transform_3, window_bounds = array<i64: 8, 128>}]} {
    %c0_i32 = arith.constant 0 : i32
    %0 = arith.cmpi eq, %arg2, %c0_i32 : i32
    %1 = arith.extui %0 : i1 to i32
    %c0_i32_0 = arith.constant 0 : i32
    %2 = arith.cmpi ne, %1, %c0_i32_0 : i32
    scf.if %2 {
      %cst_10 = arith.constant 0.000000e+00 : f32
      %12 = vector.broadcast %cst_10 : f32 to vector<8x128xf32>
      %c0_11 = arith.constant 0 : index
      %c0_12 = arith.constant 0 : index
      %13 = vector.load %arg6[%c0_11, %c0_12] : memref<8x128xf32, #tpu.memory_space<vmem>>, vector<8x128xf32>
      tpu.vector_store %arg6[%c0_11, %c0_12], %12 {strides = array<i32>} : memref<8x128xf32, #tpu.memory_space<vmem>>, vector<8x128xf32>,
    } else {
    }
    %c0 = arith.constant 0 : index
    %c0_1 = arith.constant 0 : index
    %3 = vector.load %arg6[%c0, %c0_1] : memref<8x128xf32, #tpu.memory_space<vmem>>, vector<8x128xf32>
    %c0_2 = arith.constant 0 : index
    %c0_3 = arith.constant 0 : index
    %4 = vector.load %arg3[%c0_2, %c0_3] : memref<8x128xf32, #tpu.memory_space<vmem>>, vector<8x128xf32>
    %c0_4 = arith.constant 0 : index
    %c0_5 = arith.constant 0 : index
    %5 = vector.load %arg4[%c0_4, %c0_5] : memref<128x128xf32, #tpu.memory_space<vmem>>, vector<128x128xf32>
    %cst = arith.constant dense<0.000000e+00> : vector<8x128xf32>
    %6 = tpu.matmul %4, %5, %cst {dimension_numbers = #tpu.dot_dimension_numbers<[1], [0], [0], [1], [0, 0, 1, 1], [], []>} : vector<8x128xf32>, vector<128x128xf32>, vector<8x128xf32> -> vector<8x128xf32>
    %7 = arith.addf %3, %6 : vector<8x128xf32>
    %c0_6 = arith.constant 0 : index
    %c0_7 = arith.constant 0 : index
    %8 = vector.load %arg6[%c0_6, %c0_7] : memref<8x128xf32, #tpu.memory_space<vmem>>, vector<8x128xf32>
    tpu.vector_store %arg6[%c0_6, %c0_7], %7 {strides = array<i32>} : memref<8x128xf32, #tpu.memory_space<vmem>>, vector<8x128xf32>,
    %c0_i32_8 = arith.constant 0 : i32
    %9 = arith.cmpi eq, %arg2, %c0_i32_8 : i32
    %10 = arith.extui %9 : i1 to i32
    %c0_i32_9 = arith.constant 0 : i32
    %11 = arith.cmpi ne, %10, %c0_i32_9 : i32
    scf.if %11 {
      %c0_10 = arith.constant 0 : index
      %c0_11 = arith.constant 0 : index
      %12 = vector.load %arg6[%c0_10, %c0_11] : memref<8x128xf32, #tpu.memory_space<vmem>>, vector<8x128xf32>
      %c0_12 = arith.constant 0 : index
      %c0_13 = arith.constant 0 : index
      %13 = vector.load %arg5[%c0_12, %c0_13] : memref<1x128xf32, #tpu.memory_space<vmem>>, vector<1x128xf32>
      %14 = vector.broadcast %13 : vector<1x128xf32> to vector<8x128xf32>
      %15 = arith.addf %12, %14 : vector<8x128xf32>
      %c0_14 = arith.constant 0 : index
      %c0_15 = arith.constant 0 : index
      %16 = vector.load %arg6[%c0_14, %c0_15] : memref<8x128xf32, #tpu.memory_space<vmem>>, vector<8x128xf32>
      tpu.vector_store %arg6[%c0_14, %c0_15], %15 {strides = array<i32>} : memref<8x128xf32, #tpu.memory_space<vmem>>, vector<8x128xf32>,
    } else {
    }
    return
  }
  func.func @transform_0(%arg0: i32, %arg1: i32, %arg2: i32) -> (i32, i32) {
    %c0_i32 = arith.constant 0 : i32
    return %arg0, %arg2 : i32, i32
  }
  func.func @transform_1(%arg0: i32, %arg1: i32, %arg2: i32) -> (i32, i32) {
    %c0_i32 = arith.constant 0 : i32
    return %arg2, %arg1 : i32, i32
  }
  func.func @transform_2(%arg0: i32, %arg1: i32, %arg2: i32) -> (i32, i32) {
    %c0_i32 = arith.constant 0 : i32
    %c0_i32_0 = arith.constant 0 : i32
    return %c0_i32, %arg1 : i32, i32
  }
  func.func @transform_3(%arg0: i32, %arg1: i32, %arg2: i32) -> (i32, i32) {
    %c0_i32 = arith.constant 0 : i32
    return %arg0, %arg1 : i32, i32
  }
}

</mosaic_0001>

<bundles_post_ra>
// kernel: implements_interface_forward.1
= control target key start
LH: loop header
LB: loop body
LE: loop exit
PB: predicated region body
PF: predicated region fallthrough
CT: control target
= control target key end

     0   :  { %s495_s12 = smov 0   ;;  %s497_s13 = smov 0   ;;  %s583_s0 = inlined_call_operand.vmem [shape: f32[16,128], index: 0, kind: input, shape index: {}]   ;;  %s584_s1 = inlined_call_operand.vmem [shape: f32[128,128], index: 1, kind: input, shape index: {}]   ;;  %s585_s2 = inlined_call_operand.vmem [shape: f32[1,128], index: 2, kind: input, shape index: {}]   ;;  %s586_s3 = inlined_call_operand.vmem [shape: f32[16,128], index: 3, kind: output, shape index: {}]  }
   0x1   :  { %s499_s14 = smov 0  }
   0x2 LB: > { %s32_s15 = sadd.s32 1, %s469_s13  ;;  %p420_p0 = scmp.ge.s32.totalorder %s473_s14, 1  ;;  %s473_s14 = sphi %s499_s14, %s13_s14   ;;  %s469_s13 = sphi %s497_s13, %s588_s13   ;;  %s465_s12 = sphi %s495_s12, %s587_s12  }
   0x3   : > { %p34_p1 = scmp.ge.s32.totalorder %s32_s15, 2  ;;  %p186_p2 = scmp.lt.s32.totalorder %s473_s14, 3 }
   0x5   : > { %s590_s15 = smov (%p34_p1, %s32_s15), 0  ;;  %p187_p3 = pnand %p420_p0, %p186_p2 }
   0x6   : > { %p225_p4 = scmp.lt.s32.totalorder (!%p187_p3), %s465_s12, 1 }
   0x7   : > { %190 = sbr.rel (%p187_p3) target bundleno = 173 (0xad), region = 32 }
   0xc   : > { %v273_v0 = vld [vmem:[%s584_s1 + $0x78] sm:$0xff]  ;;  %v272_v1 = vld [vmem:[%s584_s1 + $0x70] sm:$0xff]  ;;  %v271_v2 = vld [vmem:[%s584_s1 + $0x68] sm:$0xff]  ;;  %s592_s12 = smov (!%p225_p4, %s465_s12), 1 }
   0xd   : > { %274 = vmatpush.msra.mxu0 %v273_v0  ;;  %v270_v3 = vld [vmem:[%s584_s1 + $0x60] sm:$0xff]  ;;  %v269_v4 = vld [vmem:[%s584_s1 + $0x58] sm:$0xff]  ;;  %v268_v5 = vld [vmem:[%s584_s1 + $0x50] sm:$0xff]  ;;  %s421_s19 = sshll.u32 %s592_s12, 3 }
   0xe   : > { %v267_v6 = vld [vmem:[%s584_s1 + $0x48] sm:$0xff]  ;;  %v266_v7 = vld [vmem:[%s584_s1 + $0x40] sm:$0xff]  ;;  %v265_v8 = vld [vmem:[%s584_s1 + $0x38] sm:$0xff]  ;;  %s231_s26 = scalar_lea.vmem %s583_s0, %s421_s19  ;;  %s250_s5 = scalar_lea.vmem %s586_s3, %s421_s19 }
   0xf   : > { %275 = vmatpush.msra.mxu0 %v272_v1  ;;  %v264_v9 = vld [vmem:[%s584_s1 + $0x30] sm:$0xff]  ;;  %v263_v10 = vld [vmem:[%s584_s1 + $0x28] sm:$0xff]  ;;  %v262_v11 = vld [vmem:[%s584_s1 + $0x20] sm:$0xff] }
  0x10   : > { %v261_v12 = vld [vmem:[%s584_s1 + $0x18] sm:$0xff]  ;;  %v260_v13 = vld [vmem:[%s584_s1 + $0x10] sm:$0xff]  ;;  %v259_v14 = vld [vmem:[%s584_s1 + $0x8] sm:$0xff] }
  0x11   : > { %276 = vmatpush.msra.mxu0 %v271_v2  ;;  %v258_v15 = vld [vmem:[%s584_s1] sm:$0xff] }
  0x12   : > { %v257_v16 = vld [vmem:[%s231_s26] sm:$0xff] }
  0x13   : > { %277 = vmatpush.msra.mxu0 %v270_v3  ;;  %v450_v17 = vld [vmem:[%s585_s2] ss:$0 sm:$0xff] }
  0x15   : > { %278 = vmatpush.msra.mxu0 %v269_v4 }
  0x17   : > { %279 = vmatpush.msra.mxu0 %v268_v5 }
  0x19   : > { %280 = vmatpush.msra.mxu0 %v267_v6 }
  0x1b   : > { %281 = vmatpush.msra.mxu0 %v266_v7 }
  0x1d   : > { %282 = vmatpush.msra.mxu0 %v265_v8 }
  0x1f   : > { %283 = vmatpush.msra.mxu0 %v264_v9 }
  0x21   : > { %284 = vmatpush.msra.mxu0 %v263_v10 }
  0x23   : > { %285 = vmatpush.msra.mxu0 %v262_v11 }
  0x25   : > { %286 = vmatpush.msra.mxu0 %v261_v12 }
  0x27   : > { %287 = vmatpush.msra.mxu0 %v260_v13 }
  0x29   : > { %288 = vmatpush.msra.mxu0 %v259_v14 }
  0x2b   : > { %289 = vmatpush.msra.mxu0 %v258_v15 }
  0x2c   : > { %290 = vmatmul.f32.vlgmr.msra.gmra.mxu0 %v257_v16 }
  0xa9   : > { %v291_v18 = vpop.f32.mrf.mxu0 }
  0xaa   : > { %v304_v19 = vadd.f32 %v450_v17, %v291_v18 }
  0xac   : > { %305 = vst [vmem:[%s250_s5] sm:$0xff] %v304_v19 }
  0xad PF: > { %s13_s14 = sadd.s32 1, %s473_s14   ;;  %s587_s12 = smov %s469_s13 }
  0xae   : > { %p10_p5 = scmp.ge.s32.totalorder %s13_s14, 4   ;;  %s588_s13 = smov %s590_s15 }
  0xb0   :  { %12 = sbr.rel (!%p10_p5) target bundleno = 2 (0x2), region = 76 }

</bundles_post_ra>
